<compile_context>
chip_gen: v7x
topology: tpu7x:2x2x1
jax: 0.10.0
libtpu: 0.0.40
codegen_flags: <defaults>
</compile_context>

<pallas_src>
import functools

import jax
import jax.numpy as jnp
from jax import lax
from jax.experimental import pallas as pl
from jax.experimental.pallas import tpu as pltpu


def _occ_mask_kernel(base_ref, f12_ref, v21_ref, out_ref, *, H, W, th, mxu_dtype):
    # Block shapes:
    #   base_ref : (2, Tp)      base grid coords (x, y) for this pixel tile (f32)
    #   f12_ref  : (1, 2, Tp)   flow_1_2 for this pixel tile (f32)
    #   v21_ref  : (1, H, W)    channel-summed flow_2_1 image (mxu_dtype)
    #   out_ref  : (1, 1, Tp)   validity mask as int8
    base = base_ref[...]                        # (2, Tp)
    f12 = f12_ref[...]                          # (1, 2, Tp)
    v_img = v21_ref[0]                          # (H, W) pre-summed, pre-cast

    Tp = base.shape[-1]

    xs = base[0:1, :]                           # (1, Tp)
    ys = base[1:2, :]                           # (1, Tp)
    fx = f12[0, 0:1, :]                         # (1, Tp) flow_1_2 x
    fy = f12[0, 1:2, :]                         # (1, Tp) flow_1_2 y

    # target_range = base_coord + flow_1_2
    px = xs + fx                                # (1, Tp)
    py = ys + fy                                # (1, Tp)

    # inverted OOB mask (get_oob_mask) -- exact f32.
    not_oob = jnp.logical_not(
        (px < 0.0) | (px > float(W - 1)) | (py < 0.0) | (py > float(H - 1))
    )

    # Separable bilinear "tent" weights.  For in-range px the two taps get
    # (1-tx, tx); every other tap (including out-of-image columns/rows) gets 0,
    # which reproduces grid_sample's zeros padding.
    w_iota = lax.broadcasted_iota(jnp.int32, (W, Tp), 0).astype(jnp.float32)
    wx = jnp.maximum(1.0 - jnp.abs(w_iota - px), 0.0).astype(mxu_dtype)   # (W, Tp)

    h_iota = lax.broadcasted_iota(jnp.int32, (H, Tp), 0).astype(jnp.float32)
    wy = jnp.maximum(1.0 - jnp.abs(h_iota - py), 0.0)                     # (H, Tp) f32

    # Row interpolation on the MXU (bf16 x bf16 -> f32 accumulate by default),
    # column interpolation on the VPU/XLU.
    a = jnp.dot(v_img, wx, preferred_element_type=jnp.float32)            # (H, Tp)
    s = jnp.sum(wy * a, axis=0, keepdims=True)                            # (1, Tp)

    # |(sampled_flow + flow_1_2).sum(channels)| < th, inside the image.
    incons = jnp.abs(s + fx + fy)
    valid = jnp.logical_and(incons < th, not_oob)
    out_ref[0] = valid.astype(jnp.int8)


def _vmem_budget_bytes():
    """Physical VMEM capacity minus headroom for compiler-internal scratch."""
    capacity = 64 << 20                       # conservative default (v7x per-core)
    try:
        capacity = int(pltpu.get_tpu_info().vmem_capacity_bytes)
    except Exception:
        pass
    # ~56 MiB budget on v7x (64 MiB), ~112 MiB on v5e/v6e (128 MiB).
    return capacity - max(capacity // 8, 8 << 20)


def _working_set_bytes(Tp, H, W, mxu_bytes):
    """Per-grid-step VMEM working set estimate for _occ_mask_kernel."""
    # Pipeline blocks (double-buffered by Pallas): base (2,Tp) f32,
    # flow_1_2 (2,Tp) f32, v_img (H,W) mxu dtype, mask out (Tp,) i8.
    blocks = 2 * (2 * Tp * 4 + 2 * Tp * 4 + H * W * mxu_bytes + Tp)
    # In-kernel temporaries: wx (W,Tp), wy + A (H,Tp) f32, transient iota /
    # tent temporaries and a handful of (1,Tp) vectors.
    scratch = (W * Tp * mxu_bytes + 2 * H * Tp * 4
               + 2 * (H + W) * Tp * 4 + 16 * Tp * 4)
    return blocks + scratch


def _pick_pixel_tile(HW, H, W, mxu_bytes, budget):
    """Largest 128-multiple pixel tile whose working set fits the VMEM budget."""
    hw128 = ((HW + 127) // 128) * 128
    for t in (2048, 1024, 512, 256, 128):
        if t <= hw128 and _working_set_bytes(t, H, W, mxu_bytes) <= budget:
            return t
    return 128


def occ_mask(flow_1_2, flow_2_1, th=3.0, *, use_bf16_mxu=True):
    """Pallas implementation of OccMask.forward.  Inputs: (B, 2, H, W) f32.

    use_bf16_mxu=True runs the interpolation matmul in bf16 (native MXU mode,
    ~3-6x faster than multi-pass f32, half the weight/source VMEM).  Set it to
    False if strict f32 parity with PyTorch around the threshold is required.
    """
    B, C, H, W = flow_1_2.shape
    assert C == 2
    HW = H * W

    mxu_dtype = jnp.bfloat16 if use_bf16_mxu else jnp.float32
    mxu_bytes = 2 if use_bf16_mxu else 4

    budget = _vmem_budget_bytes()
    Tp = _pick_pixel_tile(HW, H, W, mxu_bytes, budget)
    HWp = pl.cdiv(HW, Tp) * Tp                 # pad pixels to a tile multiple
    P = HWp // Tp

    # Channel-summed reverse flow, pre-cast for the MXU.  (Linearity of
    # bilinear sampling: sampling the channel sum == summing sampled channels.)
    v21 = (flow_2_1[:, 0] + flow_2_1[:, 1]).astype(mxu_dtype)     # (B, H, W)

    f12 = flow_1_2.reshape(B, 2, HW)

    # Base grid coords (x = column, y = row), shared across batch; computed in
    # the wrapper so the kernel needs no per-lane integer div/mod.
    cols = jnp.arange(W, dtype=jnp.float32)
    rows = jnp.arange(H, dtype=jnp.float32)
    ww = jnp.broadcast_to(cols[None, :], (H, W)).reshape(HW)
    hh = jnp.broadcast_to(rows[:, None], (H, W)).reshape(HW)
    base = jnp.stack([ww, hh], axis=0)                             # (2, HW)

    if HWp != HW:
        pad = HWp - HW
        f12 = jnp.pad(f12, ((0, 0), (0, 0), (0, pad)))
        base = jnp.pad(base, ((0, 0), (0, pad)))

    kernel = functools.partial(_occ_mask_kernel, H=H, W=W, th=float(th),
                               mxu_dtype=mxu_dtype)

    ws = _working_set_bytes(Tp, H, W, mxu_bytes)
    vmem_limit = int(min(budget, max(2 * ws, 32 << 20)))

    out = pl.pallas_call(
        kernel,
        out_shape=jax.ShapeDtypeStruct((B, 1, HWp), jnp.int8),
        grid_spec=pltpu.PrefetchScalarGridSpec(
            num_scalar_prefetch=0,
            grid=(B, P),
            in_specs=[
                pl.BlockSpec((2, Tp), lambda b, j: (0, j)),        # base coords
                pl.BlockSpec((1, 2, Tp), lambda b, j: (b, 0, j)),  # flow_1_2 tile
                # Full channel-summed flow_2_1 image; its block index only
                # changes with b, so Pallas fetches it once per image.
                # TODO(synk): pipeline_mode=pl.Buffered(1) here (single-buffer)
                # once validated on this jax version -- saves one full-image
                # VMEM buffer, which matters most on v7x's 64 MiB.
                pl.BlockSpec((1, H, W), lambda b, j: (b, 0, 0)),
            ],
            out_specs=pl.BlockSpec((1, 1, Tp), lambda b, j: (b, 0, j)),
        ),
        compiler_params=pltpu.CompilerParams(
            # Batch axis leading so a v7x megacore split lands on B when B>=2
            # (each core then streams flow_2_1 once per image).
            dimension_semantics=("parallel", "parallel"),
            vmem_limit_bytes=vmem_limit,
        ),
    )(base, f12, v21)

    out = out[:, :, :HW].reshape(B, 1, H, W)
    return out.astype(jnp.bool_)


def _reference_occ_mask(f12, f21, th=3.0):
    """Pure-JAX reference mirroring the PyTorch semantics (for verification)."""
    B, _, H, W = f12.shape
    xs = jnp.arange(W, dtype=jnp.float32)[None, None, :]
    ys = jnp.arange(H, dtype=jnp.float32)[None, :, None]
    px = xs + f12[:, 0]
    py = ys + f12[:, 1]
    not_oob = ~((px < 0) | (px > W - 1) | (py < 0) | (py > H - 1))

    x0f = jnp.floor(px)
    y0f = jnp.floor(py)
    tx = px - x0f
    ty = py - y0f
    x0 = x0f.astype(jnp.int32)
    y0 = y0f.astype(jnp.int32)
    x1 = x0 + 1
    y1 = y0 + 1

    v = (f21[:, 0] + f21[:, 1]).reshape(B, H * W)

    def gather(xi, yi, w):
        inb = (xi >= 0) & (xi <= W - 1) & (yi >= 0) & (yi <= H - 1)
        xc = jnp.clip(xi, 0, W - 1)
        yc = jnp.clip(yi, 0, H - 1)
        idx = (yc * W + xc).reshape(B, H * W)
        vals = jnp.take_along_axis(v, idx, axis=1).reshape(B, H, W)
        return jnp.where(inb, w * vals, 0.0)

    s = (gather(x0, y0, (1 - tx) * (1 - ty))
         + gather(x1, y0, tx * (1 - ty))
         + gather(x0, y1, (1 - tx) * ty)
         + gather(x1, y1, tx * ty))
    incons = jnp.abs(s + f12[:, 0] + f12[:, 1])
    valid = (incons < th) & not_oob
    return valid[:, None], incons[:, None]


if __name__ == "__main__":
    B, H, W = 2, 16, 16
    key = jax.random.PRNGKey(0)
    k1, k2 = jax.random.split(key)
    # flows scaled so that some pixels land out of bounds / inconsistent
    flow_1_2 = jax.random.normal(k1, (B, 2, H, W), dtype=jnp.float32) * 5.0
    flow_2_1 = jax.random.normal(k2, (B, 2, H, W), dtype=jnp.float32) * 5.0

    ref_valid, ref_incons = _reference_occ_mask(flow_1_2, flow_2_1, th=3.0)
    ref_valid = jax.block_until_ready(ref_valid)

    def check(out, band):
        assert out.shape == (B, 1, H, W) and out.dtype == jnp.bool_
        mismatch = out != ref_valid
        # Boolean flips are only acceptable where the inconsistency sits
        # numerically near the threshold (different summation order / bf16).
        near_threshold = jnp.abs(ref_incons - 3.0) < band
        ok = bool(jnp.all(jnp.logical_or(~mismatch, near_threshold)))
        assert ok, f"mismatches vs reference: {int(jnp.sum(mismatch))}"

    # f32 MXU path: parity modulo f32 summation-order ties at the threshold.
    out_f32 = jax.block_until_ready(
        occ_mask(flow_1_2, flow_2_1, th=3.0, use_bf16_mxu=False))
    check(out_f32, band=5e-2)

    # Default bf16 MXU path: flips only allowed within the bf16 error band.
    out_bf16 = jax.block_until_ready(occ_mask(flow_1_2, flow_2_1, th=3.0))
    check(out_bf16, band=5e-1)

    print("KERNEL_OK")
</pallas_src>

<mosaic_0001>
module attributes {stable_mosaic.version = 11 : i64} {
  func.func @_occ_mask_kernel(%arg0: i32, %arg1: i32, %arg2: memref<2x256xf32, #tpu.memory_space<vmem>>, %arg3: memref<1x2x256xf32, #tpu.memory_space<vmem>>, %arg4: memref<1x16x16xf32, #tpu.memory_space<vmem>>, %arg5: memref<1x1x256xi8, #tpu.memory_space<vmem>>) attributes {dimension_semantics = [#tpu.dimension_semantics<parallel>, #tpu.dimension_semantics<parallel>], iteration_bounds = array<i64: 2, 1>, scalar_prefetch = 0 : i64, scratch_operands = 0 : i64, tpu.core_type = #tpu.core_type<tc>, window_params = [{transform_indices = @transform_0, window_bounds = array<i64: 2, 256>}, {transform_indices = @transform_1, window_bounds = array<i64: 1, 2, 256>}, {transform_indices = @transform_2, window_bounds = array<i64: 1, 16, 16>}, {transform_indices = @transform_3, window_bounds = array<i64: 1, 1, 256>}]} {
    %c0 = arith.constant 0 : index
    %c0_0 = arith.constant 0 : index
    %0 = vector.load %arg2[%c0, %c0_0] : memref<2x256xf32, #tpu.memory_space<vmem>>, vector<2x256xf32>
    %c0_1 = arith.constant 0 : index
    %c0_2 = arith.constant 0 : index
    %c0_3 = arith.constant 0 : index
    %1 = vector.load %arg3[%c0_1, %c0_2, %c0_3] : memref<1x2x256xf32, #tpu.memory_space<vmem>>, vector<1x2x256xf32>
    %c0_4 = arith.constant 0 : index
    %c0_5 = arith.constant 0 : index
    %c0_6 = arith.constant 0 : index
    %2 = vector.load %arg4[%c0_4, %c0_5, %c0_6] : memref<1x16x16xf32, #tpu.memory_space<vmem>>, vector<1x16x16xf32>
    %3 = vector.shape_cast %2 : vector<1x16x16xf32> to vector<16x16xf32>
    %4 = vector.extract_strided_slice %0 {offsets = [0, 0], sizes = [1, 256], strides = [1, 1]} : vector<2x256xf32> to vector<1x256xf32>
    %5 = vector.extract_strided_slice %0 {offsets = [1, 0], sizes = [1, 256], strides = [1, 1]} : vector<2x256xf32> to vector<1x256xf32>
    %6 = vector.extract_strided_slice %1 {offsets = [0, 0, 0], sizes = [1, 1, 256], strides = [1, 1, 1]} : vector<1x2x256xf32> to vector<1x1x256xf32>
    %7 = vector.shape_cast %6 : vector<1x1x256xf32> to vector<1x256xf32>
    %8 = vector.extract_strided_slice %1 {offsets = [0, 1, 0], sizes = [1, 1, 256], strides = [1, 1, 1]} : vector<1x2x256xf32> to vector<1x1x256xf32>
    %9 = vector.shape_cast %8 : vector<1x1x256xf32> to vector<1x256xf32>
    %10 = arith.addf %4, %7 : vector<1x256xf32>
    %11 = arith.addf %5, %9 : vector<1x256xf32>
    %cst = arith.constant 0.000000e+00 : f32
    %12 = vector.broadcast %cst : f32 to vector<1x256xf32>
    %13 = arith.cmpf olt, %10, %12 : vector<1x256xf32>
    %cst_7 = arith.constant 1.500000e+01 : f32
    %14 = vector.broadcast %cst_7 : f32 to vector<1x256xf32>
    %15 = arith.cmpf ogt, %10, %14 : vector<1x256xf32>
    %16 = arith.ori %13, %15 : vector<1x256xi1>
    %cst_8 = arith.constant 0.000000e+00 : f32
    %17 = vector.broadcast %cst_8 : f32 to vector<1x256xf32>
    %18 = arith.cmpf olt, %11, %17 : vector<1x256xf32>
    %19 = arith.ori %16, %18 : vector<1x256xi1>
    %cst_9 = arith.constant 1.500000e+01 : f32
    %20 = vector.broadcast %cst_9 : f32 to vector<1x256xf32>
    %21 = arith.cmpf ogt, %11, %20 : vector<1x256xf32>
    %22 = arith.ori %19, %21 : vector<1x256xi1>
    %cst_10 = arith.constant dense<true> : vector<1x256xi1>
    %23 = arith.xori %22, %cst_10 : vector<1x256xi1>
    %24 = tpu.iota {dimensions = array<i32: 0>} : vector<16x256xi32>
    %25 = arith.sitofp %24 : vector<16x256xi32> to vector<16x256xf32>
    %26 = vector.broadcast %10 : vector<1x256xf32> to vector<16x256xf32>
    %27 = arith.subf %25, %26 : vector<16x256xf32>
    %28 = math.absf %27 : vector<16x256xf32>
    %cst_11 = arith.constant 1.000000e+00 : f32
    %29 = vector.broadcast %cst_11 : f32 to vector<16x256xf32>
    %30 = arith.subf %29, %28 : vector<16x256xf32>
    %cst_12 = arith.constant 0.000000e+00 : f32
    %31 = vector.broadcast %cst_12 : f32 to vector<16x256xf32>
    %32 = arith.maximumf %30, %31 : vector<16x256xf32>
    %33 = tpu.iota {dimensions = array<i32: 0>} : vector<16x256xi32>
    %34 = arith.sitofp %33 : vector<16x256xi32> to vector<16x256xf32>
    %35 = vector.broadcast %11 : vector<1x256xf32> to vector<16x256xf32>
    %36 = arith.subf %34, %35 : vector<16x256xf32>
    %37 = math.absf %36 : vector<16x256xf32>
    %cst_13 = arith.constant 1.000000e+00 : f32
    %38 = vector.broadcast %cst_13 : f32 to vector<16x256xf32>
    %39 = arith.subf %38, %37 : vector<16x256xf32>
    %cst_14 = arith.constant 0.000000e+00 : f32
    %40 = vector.broadcast %cst_14 : f32 to vector<16x256xf32>
    %41 = arith.maximumf %39, %40 : vector<16x256xf32>
    %cst_15 = arith.constant dense<0.000000e+00> : vector<16x256xf32>
    %42 = tpu.matmul %3, %32, %cst_15 {dimension_numbers = #tpu.dot_dimension_numbers<[1], [0], [0], [1], [0, 0, 1, 1], [], []>} : vector<16x16xf32>, vector<16x256xf32>, vector<16x256xf32> -> vector<16x256xf32>
    %43 = arith.mulf %41, %42 : vector<16x256xf32>
    %cst_16 = arith.constant dense<0.000000e+00> : vector<256xf32>
    %44 = vector.multi_reduction <add>, %43, %cst_16 [0] : vector<16x256xf32> to vector<256xf32>
    %45 = vector.shape_cast %44 : vector<256xf32> to vector<1x256xf32>
    %46 = arith.addf %45, %7 : vector<1x256xf32>
    %47 = arith.addf %46, %9 : vector<1x256xf32>
    %48 = math.absf %47 : vector<1x256xf32>
    %cst_17 = arith.constant 3.000000e+00 : f32
    %49 = vector.broadcast %cst_17 : f32 to vector<1x256xf32>
    %50 = arith.cmpf olt, %48, %49 : vector<1x256xf32>
    %51 = arith.andi %50, %23 : vector<1x256xi1>
    %52 = arith.extui %51 : vector<1x256xi1> to vector<1x256xi8>
    %c0_18 = arith.constant 0 : index
    %c0_19 = arith.constant 0 : index
    %c0_20 = arith.constant 0 : index
    %53 = vector.load %arg5[%c0_18, %c0_19, %c0_20] : memref<1x1x256xi8, #tpu.memory_space<vmem>>, vector<1x1x256xi8>
    %54 = vector.shape_cast %53 : vector<1x1x256xi8> to vector<1x256xi8>
    %55 = vector.shape_cast %52 : vector<1x256xi8> to vector<1x1x256xi8>
    tpu.vector_store %arg5[%c0_18, %c0_19, %c0_20], %55 {strides = array<i32>} : memref<1x1x256xi8, #tpu.memory_space<vmem>>, vector<1x1x256xi8>,
    return
  }
  func.func @transform_0(%arg0: i32, %arg1: i32) -> (i32, i32) {
    %c0_i32 = arith.constant 0 : i32
    %c0_i32_0 = arith.constant 0 : i32
    return %c0_i32, %arg1 : i32, i32
  }
  func.func @transform_1(%arg0: i32, %arg1: i32) -> (i32, i32, i32) {
    %c0_i32 = arith.constant 0 : i32
    %c0_i32_0 = arith.constant 0 : i32
    return %arg0, %c0_i32, %arg1 : i32, i32, i32
  }
  func.func @transform_2(%arg0: i32, %arg1: i32) -> (i32, i32, i32) {
    %c0_i32 = arith.constant 0 : i32
    %c0_i32_0 = arith.constant 0 : i32
    %c0_i32_1 = arith.constant 0 : i32
    return %arg0, %c0_i32, %c0_i32_0 : i32, i32, i32
  }
  func.func @transform_3(%arg0: i32, %arg1: i32) -> (i32, i32, i32) {
    %c0_i32 = arith.constant 0 : i32
    %c0_i32_0 = arith.constant 0 : i32
    return %arg0, %c0_i32, %arg1 : i32, i32, i32
  }
}

</mosaic_0001>

<bundles_post_ra>
// kernel: tpu_custom_call.1
= control target key start
LH: loop header
LB: loop body
LE: loop exit
PB: predicated region body
PF: predicated region fallthrough
CT: control target
= control target key end

     0   :  { %8 = vsyncpa [#allocation3], 0  ;;  %s1214_s0 = inlined_call_operand.hbm [shape: f32[2,256], index: 0, kind: input, shape index: {}]   ;;  %s1215_s1 = inlined_call_operand.hbm [shape: f32[2,2,256], index: 1, kind: input, shape index: {}]   ;;  %s1216_s2 = inlined_call_operand.hbm [shape: f32[2,16,16], index: 2, kind: input, shape index: {}]   ;;  %s1217_s3 = inlined_call_operand.vmem [shape: s8[2,1,256], index: 3, kind: output, shape index: {}]  }
   0x1   :  { %9 = vsyncpa [#allocation5], 0 }
   0x2   :  { %11 = vsyncpa [#allocation5 + $0x1], 0  ;;  %s947_s12 = smov 0   ;;  %s949_s13 = smov 0  }
   0x3   :  { %s951_s14 = smov 0   ;;  %s953_s15 = smov 0  }
   0x4   :  { %s955_s16 = smov 0   ;;  %s957_s17 = smov 0  }
   0x5 LB: > { %s29_s18 = sadd.s32 1, %s912_s16  ;;  %s64_s19 = sadd.s32 1, %s904_s14  ;;  %s916_s17 = sphi %s957_s17, %s17_s17   ;;  %s912_s16 = sphi %s955_s16, %s1234_s16   ;;  %s908_s15 = sphi %s953_s15, %s1233_s15   ;;  %s904_s14 = sphi %s951_s14, %s1232_s14   ;;  %s900_s13 = sphi %s949_s13, %s1231_s13   ;;  %s896_s12 = sphi %s947_s12, %s1230_s12  }
   0x6   : > { %p31_p0 = scmp.ge.s32.totalorder %s29_s18, 2  ;;  %p71_p1 = scmp.ne.s32.totalorder %s904_s14, %s900_s13 }
   0x7   : > { %p72_p2 = scmp.eq.s32.totalorder %s916_s17, 0  ;;  %p717_p4 = scmp.lt.s32.totalorder %s916_s17, 2 }
   0x8   : > { %s1236_s18 = smov (%p31_p0, %s29_s18), 0  ;;  %s169_s21 = sand.u32 1, %s916_s17  }
   0x9   : > { %p73_p3 = por %p72_p2, %p71_p1  ;;  %s59_s20 = ssub.s32 %s912_s16, %s1236_s18 }
   0xa   : > { %p62_p5 = scmp.eq.s32.totalorder %s59_s20, 0  ;;  %s171_s22 = sand.u32 1, %s904_s14  }
   0xb   : > { %s689_s23 = sshll.u32 %s912_s16, 6  ;;  %s672_s25 = sshll.u32 %s171_s22, 2 }
   0xc   : > { %s991_s24 = scalar_select %p62_p5, %s904_s14, %s64_s19  }
   0xd   : > { %s996_s28 = scalar_lea.hbm %s1215_s1, %s689_s23  ;;  %p998_p6 = pnand %p717_p4, %p73_p3 }
   0xe   : > { %s173_s30 = scalar_lea.vmem [#allocation4], %s672_s25  ;;  %s1002_s5 = sshll.u32 %s171_s22, 4 }
   0xf   : > { %s183_s4 = sshll.u32 %s173_s30, 4  ;;  %s1006_s6 = scalar_lea.sflag [#allocation5], %s169_s21  ;;  %s1004_s4 = int_to_ptr.vmem [resolvable:$true] %s183_s4 }
  0x10   : > { %s774_s7 = scalar_lea.hbm %s996_s28, 64  ;;  %p776_p8 = pneg %p998_p6 }
  0x11   : > { %p775_p7 = scmp.ne.s32.totalorder %s996_s28, %s774_s7  ;;  %s779_s10 = scalar_lea.hbm %s1215_s1, 128 }
  0x12   : > { %p780_p11 = scmp.lt.u32.totalorder %s996_s28, %s1215_s1  ;;  %p781_p12 = scmp.lt.u32.totalorder %s779_s10, %s774_s7 }
  0x13   : > { %p777_p9 = pnand %p776_p8, %p775_p7  ;;  %p783_p0 = scmp.lt.u32.totalorder %s774_s7, %s996_s28 }
  0x14   : > { %p782_p13 = por %p781_p12, %p780_p11 }
  0x15   : > { %p778_p10 = pneg %p777_p9 }
  0x16   : > { %p784_p1 = por %p783_p0, %p782_p13 }
  0x18   : > { %p785_p2 = pnand %p784_p1, %p778_p10 }
  0x1a   : > { %788 = shalt.err (!%p785_p2)
}
  0x1b   : > { %s789_s20 = scalar_lea.vmem %s1004_s4, 64  ;;  %s918_s21 = smov [#allocation4]  }
  0x1c   : > { %p790_p3 = scmp.ne.s32.totalorder %s1004_s4, %s789_s20  ;;  %s794_s22 = sshll.u32 %s918_s21, 4  ;;  %s795_s22 = int_to_ptr.vmem [resolvable:$false] %s794_s22 }
  0x1d   : > { %s796_s23 = scalar_lea.vmem %s795_s22, 128  ;;  %p797_p7 = scmp.lt.s32.totalorder %s1004_s4, %s795_s22 }
  0x1e   : > { %p792_p4 = pnand %p790_p3, %p776_p8  ;;  %p798_p9 = scmp.lt.s32.totalorder %s796_s23, %s789_s20 }
  0x20   : > { %p793_p5 = pneg %p792_p4  ;;  %p799_p11 = por %p798_p9, %p797_p7 }
  0x22   : > { %p800_p12 = pnand %p799_p11, %p793_p5 }
  0x24   : > { %803 = shalt.err (!%p800_p12)
}
  0x25   : > { %712 = dma.hbm_to_vmem [thread:$0]  (!%p998_p6), %s996_s28, 64, %s1004_s4, %s1006_s6  }
  0x26   : > { %s690_s25 = sshll.u32 %s912_s16, 8  ;;  %s194_s26 = scalar_lea.vmem [#allocation6], %s1002_s5 }
  0x27   : > { %s201_s27 = sshll.u32 %s194_s26, 4  ;;  %s667_s30 = sadd.s32 4294967295, %s916_s17   ;;  %s1053_s27 = int_to_ptr.vmem [resolvable:$true] %s201_s27 }
  0x28   : > { %p77_p10 = scmp.ne.s32.totalorder %s900_s13, %s896_s12  ;;  %p1041_p13 = scmp.eq.s32.totalorder %s667_s30, 0 }
  0x29   : > { %p669_p0 = scmp.ge.s32.totalorder %s916_s17, 1  ;;  %p142_p1 = scmp.lt.s32.totalorder %s916_s17, 3 }
  0x2a   : > { %s1223_s7 = scalar_select %p1041_p13, 1, 0 }
  0x2b   : > { %p1049_p2 = por %p1041_p13, %p77_p10  ;;  %p1055_p3 = pnand %p669_p0, %p142_p1 }
  0x2c   : > { %s919_s12 = smov [#allocation2]   ;;  %s1062_s10 = scalar_lea.hbm %s1216_s2, %s690_s25 }
  0x2d   : > { %s1224_s8 = scalar_select %p1049_p2, 1, 0 }
  0x2e   : > { %s1225_s28 = scalar_select %p1055_p3, 1, 0 }
  0x2f   : > { %s158_s4 = sshll.u32 %s919_s12, 4  ;;  %p705_p4 = pneg %p1055_p3  ;;  %s1066_s4 = int_to_ptr.vmem [resolvable:$true] %s158_s4 }
  0x30   : > { %s804_s19 = scalar_lea.hbm %s1062_s10, 256  ;;  %s809_s22 = scalar_lea.hbm %s1216_s2, 512 }
  0x31   : > { %p1070_p5 = pnand %p705_p4, %p1041_p13  ;;  %p805_p7 = scmp.ne.s32.totalorder %s1062_s10, %s804_s19 }
  0x32   : > { %p810_p12 = scmp.lt.u32.totalorder %s1062_s10, %s1216_s2  ;;  %p811_p10 = scmp.lt.u32.totalorder %s809_s22, %s804_s19 }
  0x33   : > { %p807_p9 = pnand %p805_p7, %p776_p8  ;;  %p813_p1 = scmp.lt.u32.totalorder %s804_s19, %s1062_s10 }
  0x34   : > { %p812_p0 = por %p811_p10, %p810_p12 }
  0x35   : > { %p808_p11 = pneg %p807_p9 }
  0x36   : > { %p814_p4 = por %p813_p1, %p812_p0 }
  0x38   : > { %p815_p2 = pnand %p814_p4, %p808_p11 }
  0x3a   : > { %818 = shalt.err (!%p815_p2)
}
  0x3b   : > { %s819_s26 = scalar_lea.vmem %s1053_s27, 256  ;;  %s920_s12 = smov [#allocation6]  }
  0x3c   : > { %p820_p7 = scmp.ne.s32.totalorder %s1053_s27, %s819_s26  ;;  %s824_s5 = sshll.u32 %s920_s12, 4  ;;  %s825_s5 = int_to_ptr.vmem [resolvable:$false] %s824_s5 }
  0x3d   : > { %s826_s9 = scalar_lea.vmem %s825_s5, 512  ;;  %p827_p3 = scmp.lt.s32.totalorder %s1053_s27, %s825_s5 }
  0x3e   : > { %p822_p9 = pnand %p820_p7, %p776_p8  ;;  %p828_p12 = scmp.lt.s32.totalorder %s826_s9, %s819_s26 }
  0x40   : > { %p823_p13 = pneg %p822_p9  ;;  %p829_p10 = por %p828_p12, %p827_p3 }
  0x42   : > { %p830_p0 = pnand %p829_p10, %p823_p13 }
  0x44   : > { %833 = shalt.err (!%p830_p0)
}
  0x45   : > { %s921_s19 = smov 128   ;;  %s922_s20 = smov 8  }
  0x46   : > { %715 = dma.hbm_to_vmem [thread:$0]  (!%p998_p6), %s1062_s10, 256, %s1053_s27, %s1006_s6, %s921_s19, %s921_s19, %s922_s20  }
  0x47   : > { %s834_s23 = scalar_lea.hbm %s1214_s0, 64  ;;  %p836_p13 = pneg %p1070_p5 }
  0x48   : > { %p835_p8 = scmp.ne.s32.totalorder %s1214_s0, %s834_s23  ;;  %p841_p11 = scmp.lt.u32.totalorder %s834_s23, %s1214_s0 }
  0x4a   : > { %p837_p2 = pnand %p836_p13, %p835_p8 }
  0x4c   : > { %p838_p3 = pneg %p837_p2 }
  0x4e   : > { %p843_p1 = pnand %p841_p11, %p838_p3 }
  0x50   : > { %846 = shalt.err (!%p843_p1)
}
  0x51   : > { %s847_s29 = scalar_lea.vmem %s1066_s4, 64  ;;  %p855_p9 = scmp.lt.s32.totalorder %s1066_s4, %s1066_s4 }
  0x52   : > { %p848_p6 = scmp.ne.s32.totalorder %s1066_s4, %s847_s29  ;;  %p856_p12 = scmp.lt.s32.totalorder %s847_s29, %s847_s29 }
  0x54   : > { %p850_p4 = pnand %p848_p6, %p836_p13  ;;  %p857_p10 = por %p856_p12, %p855_p9 }
  0x56   : > { %p851_p7 = pneg %p850_p4 }
  0x58   : > { %p858_p0 = pnand %p857_p10, %p851_p7 }
  0x5a   : > { %861 = shalt.err (!%p858_p0)
}
  0x5b   : > { %708 = dma.hbm_to_vmem [thread:$0]  (!%p1070_p5), %s1214_s0, 64, %s1066_s4, [#allocation3]  }
  0x5c   : > { %p1227_p8 = scmp.ne.s32.totalorder %s1225_s28, 0 }
  0x5d   : > { %p1228_p2 = scmp.ne.s32.totalorder (!%p1227_p8), %s1223_s7, 0 }
  0x5e   : > { %213 = sbr.rel (%p1227_p8) target bundleno = 381 (0x17d), region = 32 }
  0x65   : > { %887 = dma.done.wait (%p1228_p2), [#allocation3], 64  }
  0x66   : > { %889 = vsyncadd (%p1228_p2), [#allocation3], 4294967232  ;;  %s219_s10 = sand.u32 1, %s667_s30   ;;  %s221_s11 = sand.u32 1, %s900_s13  }
  0x67   : > { %s680_s9 = sshll.u32 %s221_s11, 2  ;;  %s220_s19 = scalar_lea.sflag [#allocation5], %s219_s10 }
  0x68   : > { %s223_s4 = scalar_lea.vmem [#allocation4], %s680_s9  ;;  %p1229_p5 = scmp.ne.s32.totalorder %s1224_s8, 0 }
  0x6a   : > { %891 = dma.done.wait (%p1229_p5), %s220_s19, 320  }
  0x6b   : > { %893 = vsyncadd (%p1229_p5), %s220_s19, 4294966976  ;;  %v295_v0 = vlaneseq  ;;  %v923_v1 = vmov 0.0   ;;  %v276_v6 = vld [vmem:[#allocation2] sm:$0xf]  ;;  %v1143_v7 = vld [vmem:[%s223_s4] sm:$0xf] }
  0x6c   : > { %440 = vmatprep.mubr.f32.mxu0 %v923_v1  ;;  %446 = vmatprep.mubr.f32.mxu1 %v923_v1  ;;  %v1146_v8 = vadd.f32 %v1143_v7, %v276_v6  ;;  %s681_s30 = sshll.u32 %s221_s11, 4  ;;  %vm369_vm0 = vcmask 130048   ;;  %v924_v53 = vmov 0   ;;  %vm925_vm8 = vmmov 1   ;;  %p266_p13 = scmp.lt.s32.totalorder %s908_s15, 1 }
  0x6d   : > { %v1134_v2 = vshrl.u32 %v295_v0, 7  ;;  %s232_s7 = scalar_lea.vmem [#allocation6], %s681_s30 }
  0x6e   : > { %v278_v33 = vld [vmem:[%s232_s7] sm:$0xff]  ;;  %v279_v34 = vld [vmem:[%s232_s7 + $0x8] sm:$0xff]  ;;  %vm281_vm1 = vcmp.lt.f32.partialorder %v1146_v8, 0.0  ;;  %vm282_vm2 = vcmp.gt.f32.partialorder %v1146_v8, 15.0  ;;  %s1238_s15 = smov (!%p266_p13, %s908_s15), 1 }
  0x6f   : > { %v297_v3 = vadd.s32 8, %v1134_v2  ;;  %v1138_v4 = vsub.s32 0, %v1134_v2  ;;  %v1141_v5 = vsub.s32 2, %v1134_v2  ;;  %v298_v9 = vcvt.s32.f32 %v1134_v2  ;;  %vm283_vm3 = vmor %vm281_vm1, %vm282_vm2  ;;  %s682_s8 = sshll.u32 %s1238_s15, 1 }
  0x70   : > { %v1158_v35 = vsub.s32 1, %v1134_v2  ;;  %v341_v36 = vsub.s32 3, %v1134_v2  ;;  %v284_v54 = vsel %vm281_vm1, 1, %v924_v53  ;;  %v289_v58 = vsel %vm282_vm2, 1, %v924_v53  ;;  %s272_s21 = scalar_lea.vmem %s1217_s3, %s682_s8 }
  0x71   : > { %v299_v10 = vcvt.s32.f32 %v297_v3  ;;  %v308_v11 = vrot.slane %v1146_v8, %v1141_v5  ;;  %v304_v12 = vrot.slane %v1146_v8, %v1138_v4  ;;  %v683_v57 = vrot.slane %v284_v54, 9 }
  0x72   : > { %v338_v37 = vrot.slane %v1146_v8, %v1158_v35  ;;  %v342_v38 = vrot.slane %v1146_v8, %v341_v36  ;;  %v684_v0 = vrot.slane %v289_v58, 9  ;;  %vm534_vm2 = vcmask 1040384  }
  0x73   : > { %v318_v13 = vrot.slane %v308_v11, %v1138_v4  ;;  %v314_v14 = vrot.slane %v304_v12, %v1138_v4  ;;  %vm287_vm4 = vcmp.ne.s32.totalorder %v683_v57, 0 }
  0x74   : > { %v348_v39 = vrot.slane %v338_v37, %v1158_v35  ;;  %v352_v40 = vrot.slane %v342_v38, %v1158_v35  ;;  %vm288_vm5 = vmor %vm283_vm3, %vm287_vm4  ;;  %vm292_vm6 = vcmp.ne.s32.totalorder %v684_v0, 0  ;;  %v926_v38 = vmov 1966171168  }
  0x75   : > { %v320_v15 = vsub.f32 %v298_v9, %v318_v13  ;;  %v322_v16 = vsub.f32 %v299_v10, %v318_v13  ;;  %v319_v17 = vsub.f32 %v298_v9, %v314_v14  ;;  %v321_v18 = vsub.f32 %v299_v10, %v314_v14  ;;  %vm293_vm7 = vmor %vm288_vm5, %vm292_vm6 }
  0x76   : > { %v353_v41 = vsub.f32 %v298_v9, %v348_v39  ;;  %v355_v42 = vsub.f32 %v299_v10, %v348_v39  ;;  %v354_v43 = vsub.f32 %v298_v9, %v352_v40  ;;  %v356_v44 = vsub.f32 %v299_v10, %v352_v40  ;;  %vm294_vm9 = vmxor %vm293_vm7, %vm925_vm8 }
  0x77   : > { %v324_v19 = vand.u32 2147483647, %v320_v15  ;;  %v326_v20 = vand.u32 2147483647, %v322_v16  ;;  %v323_v21 = vand.u32 2147483647, %v319_v17  ;;  %v521_v39 = vunpack.c.l.s4 %v926_v38 }
  0x78   : > { %v325_v22 = vand.u32 2147483647, %v321_v18  ;;  %v357_v45 = vand.u32 2147483647, %v353_v41  ;;  %v359_v46 = vand.u32 2147483647, %v355_v42 }
  0x79   : > { %v328_v23 = vsub.f32 1.0, %v324_v19  ;;  %v330_v24 = vsub.f32 1.0, %v326_v20  ;;  %v327_v25 = vsub.f32 1.0, %v323_v21  ;;  %v358_v47 = vand.u32 2147483647, %v354_v43 }
  0x7a   : > { %v329_v26 = vsub.f32 1.0, %v325_v22  ;;  %v360_v48 = vand.u32 2147483647, %v356_v44  ;;  %v361_v49 = vsub.f32 1.0, %v357_v45  ;;  %v363_v50 = vsub.f32 1.0, %v359_v46 }
  0x7b   : > { %v332_v27 = vmax.f32 %v328_v23, 0.0  ;;  %v334_v28 = vmax.f32 %v330_v24, 0.0  ;;  %v331_v29 = vmax.f32 %v327_v25, 0.0  ;;  %v362_v51 = vsub.f32 1.0, %v358_v47  ;;  %v541_v42 = vld [vmem:[%s272_s21] sm:$0x3] }
  0x7c   : > { %v333_v30 = vmax.f32 %v329_v26, 0.0  ;;  %v364_v52 = vsub.f32 1.0, %v360_v48  ;;  %v365_v55 = vmax.f32 %v361_v49, 0.0  ;;  %v367_v56 = vmax.f32 %v363_v50, 0.0 }
  0x7d   : > { %v691_v31 = vpack.c.bf16 %v334_v28, %v332_v27  ;;  %v366_v59 = vmax.f32 %v362_v51, 0.0  ;;  %v475_v21 = vrot.slane %v1143_v7, %v1138_v4  ;;  %v500_v22 = vsel %vm294_vm9, 1, %v924_v53 }
  0x7e   : > { %v693_v32 = vpack.c.bf16 %v333_v30, %v331_v29  ;;  %v368_v60 = vmax.f32 %v364_v52, 0.0  ;;  %v479_v24 = vrot.slane %v1143_v7, %v1141_v5  ;;  %v487_v26 = vrot.slane %v1143_v7, %v1158_v35 }
  0x7f   : > { %692 = vmatprep.subr.bf16.mxu0 %v691_v31  ;;  %695 = vmatprep.subr.bf16.mxu1 %v691_v31  ;;  %v491_v27 = vrot.slane %v1143_v7, %v341_v36  ;;  %v504_v30 = vrot.slane %v500_v22, %v1138_v4  ;;  %v522_v7 = vunpack.c.0.s8 %v521_v39  ;;  %vm535_vm3 = vsmask.f32 0 }
  0x80   : > { %694 = vmatpush1.bf16.msra.mxu0 %v693_v32  ;;  %696 = vmatpush1.bf16.msra.mxu1 %v693_v32  ;;  %vm537_vm5 = vcmask 1041409   ;;  %vm538_vm6 = vsmask.f32 1024  ;;  %vm536_vm8 = vmand %vm534_vm2, %vm535_vm3 }
  0x81   : > { %vm509_vm10 = vcmp.ne.s32.totalorder %v504_v30, 0  ;;  %vm539_vm9 = vmand %vm537_vm5, %vm538_vm6 }
  0x83   : > { %685 = vmatmul.mubr.msk.f32.vlgmr.msra.gmra.mrb[0].mxu0 %vm369_vm0, %v278_v33  ;;  %686 = vmatmul.mubr.msk.f32.vlgmr.msra.gmra.mrb[0].mxu1 %vm369_vm0, %v279_v34  ;;  %v508_v34 = vrot.slane %v500_v22, %v1141_v5  ;;  %v525_v5 = vsub.s32 %v522_v7, %v1134_v2 }
  0x85   : > { %vm510_vm14 = vcmp.ne.s32.totalorder %v508_v34, 0 }
 0x156   : > { %v442_v61 = vpop.f32.mrb[0].mxu0  ;;  %v448_v62 = vpop.f32.mrb[0].mxu1 }
 0x157   : > { %v453_v63 = vmul.f32 %v442_v61, %v365_v55  ;;  %v455_v1 = vmul.f32 %v448_v62, %v367_v56  ;;  %v444_v3 = vpop.f32.mrb[1].mxu0  ;;  %v450_v6 = vpop.f32.mrb[1].mxu1 }
 0x158   : > { %v454_v9 = vmul.f32 %v444_v3, %v366_v59  ;;  %v456_v10 = vmul.f32 %v450_v6, %v368_v60 }
 0x159   : > { %v457_v11 = vadd.f32 %v455_v1, %v453_v63 }
 0x15a   : > { %v464_v12 = vadd.f32 %v456_v10, %v454_v9 }
 0x15b   : > { %v458_v13 = vrot.slane %v457_v11, 4 }
 0x15c   : > { %v465_v14 = vrot.slane %v464_v12, 4 }
 0x15d   : > { %v459_v15 = vadd.f32 %v458_v13, %v457_v11 }
 0x15e   : > { %v466_v16 = vadd.f32 %v465_v14, %v464_v12 }
 0x15f   : > { %v460_v17 = vrot.slane %v459_v15, 2 }
 0x160   : > { %v467_v18 = vrot.slane %v466_v16, 2 }
 0x161   : > { %v461_v19 = vadd.f32 %v460_v17, %v459_v15 }
 0x162   : > { %v468_v8 = vadd.f32 %v467_v18, %v466_v16 }
 0x163   : > { %v462_v20 = vrot.slane %v461_v19, 1 }
 0x164   : > { %v469_v23 = vrot.slane %v468_v8, 1 }
 0x165   : > { %v463_v25 = vadd.f32 %v462_v20, %v461_v19 }
 0x166   : > { %v470_v28 = vadd.f32 %v469_v23, %v468_v8 }
 0x167   : > { %v482_v29 = vadd.f32 %v475_v21, %v463_v25 }
 0x168   : > { %v483_v31 = vadd.f32 %v479_v24, %v470_v28 }
 0x169   : > { %v494_v32 = vadd.f32 %v487_v26, %v482_v29 }
 0x16a   : > { %v495_v33 = vadd.f32 %v491_v27, %v483_v31 }
 0x16b   : > { %v496_v37 = vand.u32 2147483647, %v494_v32 }
 0x16c   : > { %v497_v40 = vand.u32 2147483647, %v495_v33 }
 0x16d   : > { %vm498_vm11 = vcmp.lt.f32.partialorder %v496_v37, 3.0 }
 0x16e   : > { %vm511_vm12 = vmand %vm498_vm11, %vm509_vm10  ;;  %vm499_vm13 = vcmp.lt.f32.partialorder %v497_v40, 3.0 }
 0x16f   : > { %vm513_vm15 = vmpackc.low %vm511_vm12, %vm511_vm12 }
 0x170   : > { %vm514_vm0 = vmpackc.even %vm513_vm15, %vm513_vm15 }
 0x171   : > { %vm512_vm1 = vmand %vm499_vm13, %vm510_vm14  ;;  %v517_v4 = vsel %vm514_vm0, 16843009, %v924_v53 }
 0x172   : > { %vm515_vm4 = vmpackc.low %vm512_vm1, %vm512_vm1 }
 0x173   : > { %vm516_vm7 = vmpackc.even %vm515_vm4, %vm515_vm4 }
 0x174   : > { %v518_v35 = vsel %vm516_vm7, 16843009, %v924_v53  ;;  %vm540_vm10 = vmor %vm539_vm9, %vm536_vm8 }
 0x175   : > { %v519_v36 = vcombine.low %v517_v4, %v518_v35 }
 0x177   : > { %v526_v41 = vrot.slane %v519_v36, %v525_v5 }
 0x179   : > { %v533_v43 = vrot.slane %v526_v41, %v525_v5 }
 0x17b   : > { %v542_v44 = vsel %vm540_vm10, %v533_v43, %v541_v42 }
 0x17c   : > { %543 = vst [vmem:[%s272_s21] sm:$0x3] %v542_v44 }
 0x17d PF: > { %s17_s17 = sadd.s32 1, %s916_s17   ;;  %s1230_s12 = smov %s900_s13 }
 0x17e   : > { %p14_p3 = scmp.ge.s32.totalorder %s17_s17, 4   ;;  %s1231_s13 = smov %s904_s14 }
 0x17f   : > { %s1232_s14 = smov %s991_s24  ;;  %s1233_s15 = smov %s912_s16 }
 0x180   : > { %s1234_s16 = smov %s1236_s18  ;;  %16 = sbr.rel (!%p14_p3) target bundleno = 5 (0x5), region = 89 }
 0x187   :  { %572 = vsyncpa [#allocation3], 1 }
 0x188   :  { %574 = vsyncpa [#allocation3 + $0x1], 1 }
 0x189   :  { %575 = vsyncpa [#allocation5], 1 }
 0x18a   :  { %577 = vsyncpa [#allocation5 + $0x1], 1 }

</bundles_post_ra>
